<compile_context>
chip_gen: v5e
topology: v5e:2x2
jax: 0.10.0
libtpu: 0.0.40
codegen_flags: <defaults>
</compile_context>

<pallas_src>
import functools

import jax
import jax.numpy as jnp
from jax.experimental import pallas as pl
from jax.experimental.pallas import tpu as pltpu

LANE = 128
SUBLANE = 8


def _round_up(n, m):
    return (n + m - 1) // m * m


def _fused_mlp_kernel(x_ref, *refs, num_layers):
    """Fused BIMT MLP: h = x; for each layer h = h @ W + b, relu except last.

    refs layout: (w_0, b_0, w_1, b_1, ..., w_{L-1}, b_{L-1}, o_ref).
    Weights are bf16, zero-padded to lane-dense (multiple-of-128) shapes;
    biases are f32. Dots run bf16 x bf16 -> f32 on the MXU; bias/ReLU in f32.
    Intermediate activations live in vregs/VMEM only.
    """
    o_ref = refs[2 * num_layers]
    h = x_ref[...].astype(jnp.bfloat16)  # cast on the VMEM tile, not in HBM
    for l in range(num_layers):
        w = refs[2 * l][...]        # (Kp, Np) bf16
        b = refs[2 * l + 1][...]    # (1, Np) f32 -> broadcasts over batch
        h = jnp.dot(h, w, preferred_element_type=jnp.float32) + b
        if l < num_layers - 1:
            h = jnp.maximum(h, 0.0).astype(jnp.bfloat16)
    o_ref[...] = h.astype(o_ref.dtype)


def _prepare_padded_params(params, K0):
    """Zero-pad weights/biases so every activation width is a multiple of 128.

    Exact: padded hidden units see weight=0 and bias=0, relu(0)=0, so they
    contribute nothing downstream; padded output columns are sliced off.
    Weights are stored bf16 (MXU-native), biases stay f32.
    """
    dims = [_round_up(K0, LANE)]
    for p in params:
        dims.append(_round_up(p["weights"].shape[1], LANE))
    flat_wb = []
    for l, p in enumerate(params):
        kf, nf = p["weights"].shape
        kp, np_ = dims[l], dims[l + 1]
        w = jnp.zeros((kp, np_), jnp.bfloat16)
        w = w.at[:kf, :nf].set(p["weights"].astype(jnp.bfloat16))
        b = jnp.zeros((1, np_), jnp.float32)
        b = b.at[0, :nf].set(p["biases"].astype(jnp.float32))
        flat_wb.append(w)
        flat_wb.append(b)
    return dims, flat_wb


def _vmem_capacity_bytes():
    try:
        return int(pltpu.get_tpu_info().vmem_capacity_bytes)
    except Exception:
        return 64 * 1024 * 1024  # v7x per-TC VMEM: most conservative fallback


def bimt_fused_forward(params, x, *, batch_tile=1024):
    """Forward pass of BIMTNetwork: flatten -> [linear+relu]* -> linear.

    One Pallas call for the whole network. Small batches (byte-budget checked
    against VMEM capacity) run as a single grid-less VMEM-resident block;
    larger batches tile B over a 'parallel' grid axis (>=2 blocks so v7x's two
    TensorCores both work) with weights fully resident.
    """
    B = x.shape[0]
    xf = x.reshape(B, -1)  # same as torch x.view(B, -1); native dtype
    K0 = xf.shape[1]
    num_layers = len(params)
    n_out = params[-1]["weights"].shape[1]

    dims, flat_wb = _prepare_padded_params(params, K0)
    K0p, n_out_pad = dims[0], dims[-1]
    if K0p != K0:
        xf = jnp.pad(xf, ((0, 0), (0, K0p - K0)))

    kernel = functools.partial(_fused_mlp_kernel, num_layers=num_layers)
    w_bytes = sum(int(a.size) * a.dtype.itemsize for a in flat_wb)

    def cost(n_rows):
        flops = 2 * n_rows * sum(a * b for a, b in zip(dims[:-1], dims[1:]))
        bytes_accessed = (
            n_rows * K0p * xf.dtype.itemsize + w_bytes + n_rows * n_out_pad * 4
        )
        return pl.CostEstimate(
            flops=flops, transcendentals=0, bytes_accessed=bytes_accessed
        )

    # --- Small-batch, grid-less path: everything resident in VMEM.
    footprint = (
        B * K0p * xf.dtype.itemsize      # input block
        + w_bytes                         # all weights + biases
        + 3 * B * max(dims) * 4           # intermediates (f32 + bf16) + output
    )
    if B <= max(1, batch_tile // 2) and 2 * footprint < _vmem_capacity_bytes():
        out = pl.pallas_call(
            kernel,
            out_shape=jax.ShapeDtypeStruct((B, n_out_pad), jnp.float32),
            in_specs=[pl.BlockSpec(memory_space=pltpu.MemorySpace.VMEM)]
            * (1 + 2 * num_layers),
            out_specs=pl.BlockSpec(memory_space=pltpu.MemorySpace.VMEM),
            cost_estimate=cost(B),
        )(xf, *flat_wb)
        return out[:, :n_out]

    # --- Batch-tiled path: tile B over a 'parallel' grid axis; guarantee >= 2
    # blocks so both v7x TensorCores get work; pad B so every block is full.
    bt = min(batch_tile, _round_up(B, SUBLANE))
    if pl.cdiv(B, bt) < 2:
        bt = max(SUBLANE, _round_up(pl.cdiv(B, 2), SUBLANE))
    n_blocks = pl.cdiv(B, bt)
    B_pad = n_blocks * bt
    if B_pad != B:
        xf = jnp.pad(xf, ((0, B_pad - B), (0, 0)))

    def make_call(weight_pipeline_mode):
        in_specs = [pl.BlockSpec((bt, K0p), lambda i: (i, 0))]
        for l in range(num_layers):
            kp, np_ = dims[l], dims[l + 1]
            in_specs.append(
                pl.BlockSpec((kp, np_), lambda i: (0, 0),
                             pipeline_mode=weight_pipeline_mode)
            )
            in_specs.append(
                pl.BlockSpec((1, np_), lambda i: (0, 0),
                             pipeline_mode=weight_pipeline_mode)
            )
        return pl.pallas_call(
            kernel,
            out_shape=jax.ShapeDtypeStruct((B_pad, n_out_pad), jnp.float32),
            grid=(n_blocks,),
            in_specs=in_specs,
            out_specs=pl.BlockSpec((bt, n_out_pad), lambda i: (i, 0)),
            compiler_params=pltpu.CompilerParams(
                dimension_semantics=("parallel",),
            ),
            cost_estimate=cost(B_pad),
        )

    try:
        # Grid-invariant weights/biases don't need double buffering.
        out = make_call(pl.Buffered(1))(xf, *flat_wb)
    except Exception:
        # Fallback: default pipelining if Buffered(1) is rejected by this jax.
        out = make_call(None)(xf, *flat_wb)
    return out[:B, :n_out]


def init_bimt_params(key, layer_sizes):
    """Deterministic randn init matching BIMTLayer's __init__ shapes."""
    params = []
    for in_f, out_f in zip(layer_sizes[:-1], layer_sizes[1:]):
        key, kw, kb, kc = jax.random.split(key, 4)
        params.append(
            dict(
                weights=jax.random.normal(kw, (in_f, out_f), dtype=jnp.float32),
                biases=jax.random.normal(kb, (out_f,), dtype=jnp.float32),
                # buffer, unused in forward (only connection_cost uses it)
                coordinates=jax.random.normal(kc, (in_f, out_f), dtype=jnp.float32),
            )
        )
    return params


def connection_cost(params, scale_factor):
    # Not a hot path; plain JAX (norm over axis 0 of the coordinates buffer).
    cost = sum(jnp.sum(jnp.linalg.norm(p["coordinates"], axis=0)) for p in params)
    return cost * scale_factor


def _reference_forward_bf16(params, x):
    """Plain-JAX reference with the SAME numerics as the kernel:
    bf16 matmul inputs, f32 accumulation, f32 bias + ReLU."""
    h = x.reshape(x.shape[0], -1)
    L = len(params)
    for i, p in enumerate(params):
        h = (
            jnp.dot(
                h.astype(jnp.bfloat16),
                p["weights"].astype(jnp.bfloat16),
                preferred_element_type=jnp.float32,
            )
            + p["biases"].astype(jnp.float32)
        )
        if i < L - 1:
            h = jnp.maximum(h, 0.0)
    return h


if __name__ == "__main__":
    key = jax.random.PRNGKey(0)
    key, kx = jax.random.split(key)

    # Small MNIST-like setup: NCHW input (2, 1, 16, 16) -> 256 flat features.
    B, C, H, W = 2, 1, 16, 16
    x = jax.random.normal(kx, (B, C, H, W), dtype=jnp.float32)

    layer_sizes = [C * H * W, 128, 64, 10]
    params = init_bimt_params(key, layer_sizes)

    # Path 1: fused single-block (grid-less, fully VMEM-resident) kernel.
    out = bimt_fused_forward(params, x)
    out = jax.block_until_ready(out)
    assert out.shape == (B, layer_sizes[-1]), out.shape
    ref = _reference_forward_bf16(params, x)
    assert jnp.allclose(out, ref, atol=5e-2, rtol=1e-2), (
        float(jnp.max(jnp.abs(out - ref)))
    )

    # Path 2: exercise the batch-tiled 'parallel' grid path (>=2 blocks, padding).
    key, kx2 = jax.random.split(key)
    B2 = 10
    x2 = jax.random.normal(kx2, (B2, C, H, W), dtype=jnp.float32)
    out2 = bimt_fused_forward(params, x2, batch_tile=8)
    out2 = jax.block_until_ready(out2)
    ref2 = _reference_forward_bf16(params, x2)
    assert out2.shape == (B2, layer_sizes[-1]), out2.shape
    assert jnp.allclose(out2, ref2, atol=5e-2, rtol=1e-2), (
        float(jnp.max(jnp.abs(out2 - ref2)))
    )

    print("KERNEL_OK")
</pallas_src>

<mosaic_0001>
module attributes {stable_mosaic.version = 11 : i64} {
  func.func @_fused_mlp_kernel(%arg0: memref<2x256xf32, #tpu.memory_space<vmem>>, %arg1: memref<256x128xbf16, #tpu.memory_space<vmem>>, %arg2: memref<1x128xf32, #tpu.memory_space<vmem>>, %arg3: memref<128x128xbf16, #tpu.memory_space<vmem>>, %arg4: memref<1x128xf32, #tpu.memory_space<vmem>>, %arg5: memref<128x128xbf16, #tpu.memory_space<vmem>>, %arg6: memref<1x128xf32, #tpu.memory_space<vmem>>, %arg7: memref<2x128xf32, #tpu.memory_space<vmem>>) attributes {dimension_semantics = [], scalar_prefetch = 0 : i64, scratch_operands = 0 : i64, tpu.core_type = #tpu.core_type<tc>} {
    %c0 = arith.constant 0 : index
    %c0_0 = arith.constant 0 : index
    %0 = vector.load %arg0[%c0, %c0_0] : memref<2x256xf32, #tpu.memory_space<vmem>>, vector<2x256xf32>
    %1 = arith.truncf %0 : vector<2x256xf32> to vector<2x256xbf16>
    %c0_1 = arith.constant 0 : index
    %c0_2 = arith.constant 0 : index
    %2 = vector.load %arg1[%c0_1, %c0_2] : memref<256x128xbf16, #tpu.memory_space<vmem>>, vector<256x128xbf16>
    %c0_3 = arith.constant 0 : index
    %c0_4 = arith.constant 0 : index
    %3 = vector.load %arg2[%c0_3, %c0_4] : memref<1x128xf32, #tpu.memory_space<vmem>>, vector<1x128xf32>
    %cst = arith.constant dense<0.000000e+00> : vector<2x128xf32>
    %4 = tpu.matmul %1, %2, %cst {dimension_numbers = #tpu.dot_dimension_numbers<[1], [0], [0], [1], [0, 0, 1, 1], [], []>} : vector<2x256xbf16>, vector<256x128xbf16>, vector<2x128xf32> -> vector<2x128xf32>
    %5 = vector.broadcast %3 : vector<1x128xf32> to vector<2x128xf32>
    %6 = arith.addf %4, %5 : vector<2x128xf32>
    %cst_5 = arith.constant 0.000000e+00 : f32
    %7 = vector.broadcast %cst_5 : f32 to vector<2x128xf32>
    %8 = arith.maximumf %6, %7 : vector<2x128xf32>
    %9 = arith.truncf %8 : vector<2x128xf32> to vector<2x128xbf16>
    %c0_6 = arith.constant 0 : index
    %c0_7 = arith.constant 0 : index
    %10 = vector.load %arg3[%c0_6, %c0_7] : memref<128x128xbf16, #tpu.memory_space<vmem>>, vector<128x128xbf16>
    %c0_8 = arith.constant 0 : index
    %c0_9 = arith.constant 0 : index
    %11 = vector.load %arg4[%c0_8, %c0_9] : memref<1x128xf32, #tpu.memory_space<vmem>>, vector<1x128xf32>
    %cst_10 = arith.constant dense<0.000000e+00> : vector<2x128xf32>
    %12 = tpu.matmul %9, %10, %cst_10 {dimension_numbers = #tpu.dot_dimension_numbers<[1], [0], [0], [1], [0, 0, 1, 1], [], []>} : vector<2x128xbf16>, vector<128x128xbf16>, vector<2x128xf32> -> vector<2x128xf32>
    %13 = vector.broadcast %11 : vector<1x128xf32> to vector<2x128xf32>
    %14 = arith.addf %12, %13 : vector<2x128xf32>
    %cst_11 = arith.constant 0.000000e+00 : f32
    %15 = vector.broadcast %cst_11 : f32 to vector<2x128xf32>
    %16 = arith.maximumf %14, %15 : vector<2x128xf32>
    %17 = arith.truncf %16 : vector<2x128xf32> to vector<2x128xbf16>
    %c0_12 = arith.constant 0 : index
    %c0_13 = arith.constant 0 : index
    %18 = vector.load %arg5[%c0_12, %c0_13] : memref<128x128xbf16, #tpu.memory_space<vmem>>, vector<128x128xbf16>
    %c0_14 = arith.constant 0 : index
    %c0_15 = arith.constant 0 : index
    %19 = vector.load %arg6[%c0_14, %c0_15] : memref<1x128xf32, #tpu.memory_space<vmem>>, vector<1x128xf32>
    %cst_16 = arith.constant dense<0.000000e+00> : vector<2x128xf32>
    %20 = tpu.matmul %17, %18, %cst_16 {dimension_numbers = #tpu.dot_dimension_numbers<[1], [0], [0], [1], [0, 0, 1, 1], [], []>} : vector<2x128xbf16>, vector<128x128xbf16>, vector<2x128xf32> -> vector<2x128xf32>
    %21 = vector.broadcast %19 : vector<1x128xf32> to vector<2x128xf32>
    %22 = arith.addf %20, %21 : vector<2x128xf32>
    %c0_17 = arith.constant 0 : index
    %c0_18 = arith.constant 0 : index
    %23 = vector.load %arg7[%c0_17, %c0_18] : memref<2x128xf32, #tpu.memory_space<vmem>>, vector<2x128xf32>
    tpu.vector_store %arg7[%c0_17, %c0_18], %22 {strides = array<i32>} : memref<2x128xf32, #tpu.memory_space<vmem>>, vector<2x128xf32>,
    return
  }
}

</mosaic_0001>

<bundles_post_ra>
// kernel: tpu_custom_call.1
= control target key start
LH: loop header
LB: loop body
LE: loop exit
PB: predicated region body
PF: predicated region fallthrough
CT: control target
= control target key end

     0   :  { %12 = vsyncpa [#allocation3], 0  ;;  %s810_s0 = inlined_call_operand.hbm [shape: f32[2,256], index: 0, kind: input, shape index: {}]   ;;  %s811_s1 = inlined_call_operand.hbm [shape: bf16[256,128], index: 1, kind: input, shape index: {}]   ;;  %s812_s2 = inlined_call_operand.vmem [shape: f32[1,128], index: 2, kind: input, shape index: {}]   ;;  %s813_s3 = inlined_call_operand.hbm [shape: bf16[128,128], index: 3, kind: input, shape index: {}]   ;;  %s814_s4 = inlined_call_operand.vmem [shape: f32[1,128], index: 4, kind: input, shape index: {}]   ;;  %s815_s5 = inlined_call_operand.hbm [shape: bf16[128,128], index: 5, kind: input, shape index: {}]   ;;  %s816_s6 = inlined_call_operand.vmem [shape: f32[1,128], index: 6, kind: input, shape index: {}]   ;;  %s817_s7 = inlined_call_operand.hbm [shape: f32[2,128], index: 7, kind: output, shape index: {}]  }
   0x1   :  { %13 = vsyncpa [#allocation6], 0 }
   0x2   :  { %14 = vsyncpa [#allocation9], 0  ;;  %s31_s26 = sshll.u32 %s811_s1, 4  ;;  %s32_s26 = int_to_ptr.hbm [resolvable:$true] %s31_s26 }
   0x3   :  { %15 = vsyncpa [#allocation4], 0  ;;  %s739_s27 = smov [#allocation5]   ;;  %s21_s8 = sshll.u32 %s810_s0, 4  ;;  %s22_s8 = int_to_ptr.hbm [resolvable:$true] %s21_s8 }
   0x4   :  { %s33_s28 = sshll.u32 %s739_s27, 4  ;;  %s740_s9 = smov 64   ;;  %s34_s28 = int_to_ptr.vmem [resolvable:$true] %s33_s28 }
   0x5   :  { %s741_s10 = smov 4   ;;  %s742_s11 = smov [#allocation2]  }
   0x6   :  { %39 = dma.hbm_to_vmem [thread:$0]  %s32_s26, 2048, %s34_s28, [#allocation6], %s740_s9, %s740_s9, %s741_s10  }
   0x7   :  { %s23_s12 = sshll.u32 %s742_s11, 4  ;;  %s46_s15 = sshll.u32 %s813_s3, 4  ;;  %s24_s12 = int_to_ptr.vmem [resolvable:$true] %s23_s12  ;;  %s47_s15 = int_to_ptr.hbm [resolvable:$true] %s46_s15 }
   0x8   :  { %26 = dma.hbm_to_vmem [thread:$0]  %s22_s8, 64, %s24_s12, [#allocation3]  }
   0x9   :  { %s61_s17 = sshll.u32 %s815_s5, 4  ;;  %s743_s18 = smov [#allocation7]   ;;  %s62_s17 = int_to_ptr.hbm [resolvable:$true] %s61_s17 }
   0xa   :  { %s48_s19 = sshll.u32 %s743_s18, 4  ;;  %s744_s0 = smov [#allocation8]   ;;  %s49_s19 = int_to_ptr.vmem [resolvable:$true] %s48_s19 }
   0xb   :  { %54 = dma.hbm_to_vmem [thread:$0]  %s47_s15, 1024, %s49_s19, [#allocation6], %s740_s9, %s740_s9, %s741_s10  }
   0xc   :  { %s63_s20 = sshll.u32 %s744_s0, 4  ;;  %s64_s20 = int_to_ptr.vmem [resolvable:$true] %s63_s20 }
   0xd   :  { %69 = dma.hbm_to_vmem [thread:$0]  %s62_s17, 1024, %s64_s20, [#allocation9], %s740_s9, %s740_s9, %s741_s10  }
   0xe   :  { %731 = dma.done.wait [#allocation3], 64  }
   0xf   :  { %732 = vsyncadd [#allocation3], 4294967232 }
  0x10   :  { %733 = dma.done.wait [#allocation6], 3072  }
  0x11   :  { %734 = vsyncadd [#allocation6], 4294964224 }
  0x12   :  { %735 = dma.done.wait [#allocation9], 1024  }
  0x13   :  { %736 = vsyncadd [#allocation9], 4294966272  ;;  %v576_v0 = vld [vmem:[#allocation5 + $0x38] sm:$0xff]  ;;  %v575_v2 = vld [vmem:[#allocation5 + $0x30] sm:$0xff]  ;;  %s745_s24 = smov [#allocation10]   ;;  %s429_s28 = sshll.u32 %s817_s7, 4  ;;  %s430_s28 = int_to_ptr.hbm [resolvable:$true] %s429_s28 }
  0x14   :  { %v584_v1 = vld [vmem:[#allocation5 + $0x78] sm:$0xff]  ;;  %229 = vmatpush.bf16.msra.mxu0 %v576_v0  ;;  %v583_v3 = vld [vmem:[#allocation5 + $0x70] sm:$0xff]  ;;  %v574_v6 = vld [vmem:[#allocation5 + $0x28] sm:$0xff]  ;;  %s427_s25 = sshll.u32 %s745_s24, 4  ;;  %s428_s25 = int_to_ptr.vmem [resolvable:$true] %s427_s25 }
  0x15   :  { %242 = vmatpush.bf16.msra.mxu1 %v584_v1  ;;  %v88_v4 = vld [vmem:[#allocation2] sm:$0xf]  ;;  %v582_v7 = vld [vmem:[#allocation5 + $0x68] sm:$0xff]  ;;  %v591_v8 = vld [vmem:[#allocation7 + $0x30] sm:$0xff] }
  0x16   :  { %v592_v5 = vld [vmem:[#allocation7 + $0x38] sm:$0xff]  ;;  %90 = vst [vmem:[#allocation1] ss:$4 sm:$0xff] %v88_v4  ;;  %v573_v9 = vld [vmem:[#allocation5 + $0x20] sm:$0xff]  ;;  %v590_v11 = vld [vmem:[#allocation7 + $0x28] sm:$0xff] }
  0x17   :  { %325 = vmatpush.bf16.msra.mxu2 %v592_v5  ;;  %v581_v10 = vld [vmem:[#allocation5 + $0x60] sm:$0xff]  ;;  %v572_v12 = vld [vmem:[#allocation5 + $0x18] sm:$0xff]  ;;  %v571_v15 = vld [vmem:[#allocation5 + $0x10] sm:$0xff] }
  0x18   :  { %230 = vmatpush.bf16.msra.mxu0 %v575_v2  ;;  %v580_v13 = vld [vmem:[#allocation5 + $0x58] sm:$0xff]  ;;  %v589_v14 = vld [vmem:[#allocation7 + $0x20] sm:$0xff]  ;;  %v579_v16 = vld [vmem:[#allocation5 + $0x50] sm:$0xff] }
  0x19   :  { %243 = vmatpush.bf16.msra.mxu1 %v583_v3  ;;  %v588_v17 = vld [vmem:[#allocation7 + $0x18] sm:$0xff]  ;;  %v570_v18 = vld [vmem:[#allocation5 + $0x8] sm:$0xff]  ;;  %v587_v20 = vld [vmem:[#allocation7 + $0x10] sm:$0xff] }
  0x1a   :  { %v578_v19 = vld [vmem:[#allocation5 + $0x48] sm:$0xff]  ;;  %v569_v21 = vld [vmem:[#allocation5] sm:$0xff]  ;;  %v600_v29 = vld [vmem:[#allocation8 + $0x38] sm:$0xff] }
  0x1b   :  { %326 = vmatpush.bf16.msra.mxu2 %v591_v8  ;;  %v577_v22 = vld [vmem:[#allocation5 + $0x40] sm:$0xff]  ;;  %v586_v27 = vld [vmem:[#allocation7 + $0x8] sm:$0xff]  ;;  %408 = vmatpush.bf16.msra.mxu3 %v600_v29  ;;  %v599_v30 = vld [vmem:[#allocation8 + $0x30] sm:$0xff] }
  0x1c   :  { %231 = vmatpush.bf16.msra.mxu0 %v574_v6  ;;  %v585_v28 = vld [vmem:[#allocation7] sm:$0xff]  ;;  %v598_v31 = vld [vmem:[#allocation8 + $0x28] sm:$0xff]  ;;  %v596_v33 = vld [vmem:[#allocation8 + $0x18] sm:$0xff] }
  0x1d   :  { %244 = vmatpush.bf16.msra.mxu1 %v582_v7  ;;  %v91_v23 = vld.sshfl [vmem:[#allocation1] sm:$0xff pattern:$0x73625140]  ;;  %v92_v24 = vld.sshfl [vmem:[#allocation1 + $0x8] sm:$0xff pattern:$0x73625140] }
  0x1e   :  { %v95_v25 = vpack.c.bf16 %v91_v23, %v91_v23  ;;  %v96_v26 = vpack.c.bf16 %v92_v24, %v92_v24  ;;  %v597_v32 = vld [vmem:[#allocation8 + $0x20] sm:$0xff]  ;;  %v595_v34 = vld [vmem:[#allocation8 + $0x10] sm:$0xff]  ;;  %v594_v44 = vld [vmem:[#allocation8 + $0x8] sm:$0xff] }
  0x1f   :  { %327 = vmatpush.bf16.msra.mxu2 %v590_v11  ;;  %409 = vmatpush.bf16.msra.mxu3 %v599_v30  ;;  %v608_v35 = vld [vmem:[%s812_s2] ss:$0 sm:$0xff]  ;;  %v593_v45 = vld [vmem:[#allocation8] sm:$0xff] }
  0x20   :  { %232 = vmatpush.bf16.msra.mxu0 %v573_v9  ;;  %v609_v46 = vld [vmem:[%s814_s4] ss:$0 sm:$0xff] }
  0x21   :  { %245 = vmatpush.bf16.msra.mxu1 %v581_v10  ;;  %v610_v52 = vld [vmem:[%s816_s6] ss:$0 sm:$0xff] }
  0x23   :  { %328 = vmatpush.bf16.msra.mxu2 %v589_v14  ;;  %410 = vmatpush.bf16.msra.mxu3 %v598_v31 }
  0x24   :  { %233 = vmatpush.bf16.msra.mxu0 %v572_v12 }
  0x25   :  { %246 = vmatpush.bf16.msra.mxu1 %v580_v13 }
  0x27   :  { %329 = vmatpush.bf16.msra.mxu2 %v588_v17  ;;  %411 = vmatpush.bf16.msra.mxu3 %v597_v32 }
  0x28   :  { %234 = vmatpush.bf16.msra.mxu0 %v571_v15 }
  0x29   :  { %247 = vmatpush.bf16.msra.mxu1 %v579_v16 }
  0x2b   :  { %330 = vmatpush.bf16.msra.mxu2 %v587_v20  ;;  %412 = vmatpush.bf16.msra.mxu3 %v596_v33 }
  0x2c   :  { %235 = vmatpush.bf16.msra.mxu0 %v570_v18 }
  0x2d   :  { %248 = vmatpush.bf16.msra.mxu1 %v578_v19 }
  0x2f   :  { %331 = vmatpush.bf16.msra.mxu2 %v586_v27  ;;  %413 = vmatpush.bf16.msra.mxu3 %v595_v34 }
  0x30   :  { %236 = vmatpush.bf16.msra.mxu0 %v569_v21 }
  0x31   :  { %249 = vmatpush.bf16.msra.mxu1 %v577_v22 }
  0x33   :  { %237 = vmatmul.bf16.vlgmr.msra.gmra.mxu0 %v95_v25  ;;  %332 = vmatpush.bf16.msra.mxu2 %v585_v28 }
  0x34   :  { %250 = vmatmul.bf16.vlgmr.msra.gmra.mxu1 %v96_v26  ;;  %414 = vmatpush.bf16.msra.mxu3 %v594_v44 }
  0x38   :  { %415 = vmatpush.bf16.msra.mxu3 %v593_v45 }
  0xb0   :  { %v238_v36 = vpop.f32.mrf.mxu0 }
  0xb1   :  { %v251_v37 = vpop.f32.mrf.mxu1  ;;  %v239_v38 = vadd.f32 %v608_v35, %v238_v36 }
  0xb3   :  { %v252_v39 = vadd.f32 %v251_v37, %v239_v38 }
  0xb5   :  { %v255_v40 = vmax.f32 %v252_v39, 0.0 }
  0xb7   :  { %v256_v41 = vpack.c.bf16 %v255_v40, %v255_v40 }
  0xb8   :  { %v240_v42 = vpop.f32.mrf.mxu0 }
  0xb9   :  { %v253_v43 = vpop.f32.mrf.mxu1  ;;  %333 = vmatmul.bf16.vlgmr.msra.gmra.mxu2 %v256_v41 }
 0x13c   :  { %v334_v47 = vpop.f32.mrf.mxu2 }
 0x13d   :  { %v335_v48 = vadd.f32 %v609_v46, %v334_v47 }
 0x13f   :  { %v338_v49 = vmax.f32 %v335_v48, 0.0 }
 0x141   :  { %v339_v50 = vpack.c.bf16 %v338_v49, %v338_v49 }
 0x143   :  { %416 = vmatmul.bf16.vlgmr.msra.gmra.mxu3 %v339_v50 }
 0x144   :  { %v336_v51 = vpop.f32.mrf.mxu2 }
 0x1c6   :  { %v417_v53 = vpop.f32.mrf.mxu3 }
 0x1c7   :  { %v418_v54 = vadd.f32 %v610_v52, %v417_v53 }
 0x1c9   :  { %421 = vst [vmem:[#allocation10] sm:$0x3] %v418_v54 }
 0x1ca   :  { %432 = dma.vmem_to_hbm [thread:$0]  %s428_s25, 32, %s430_s28, [#allocation4]  }
 0x1ce   :  { %v419_v55 = vpop.f32.mrf.mxu3 }
 0x1cf   :  { %737 = dma.done.wait [#allocation4], 32  }
 0x1d0   :  { %738 = vsyncadd [#allocation4], 4294967264 }
 0x1d1   :  { %437 = vsyncpa [#allocation3], 1 }
 0x1d2   :  { %438 = vsyncpa [#allocation6], 1 }
 0x1d3   :  { %439 = vsyncpa [#allocation9], 1 }
 0x1d4   :  { %440 = vsyncpa [#allocation4], 1 }

</bundles_post_ra>
